<compile_context>
chip_gen: v7x
topology: tpu7x:2x2x1
jax: 0.10.0
libtpu: 0.0.40
codegen_flags: <defaults>
</compile_context>

<pallas_src>
import functools

import jax
import jax.numpy as jnp
from jax.experimental import pallas as pl
from jax.experimental.pallas import tpu as pltpu

_EPS = 1e-6  # torch.nn.PairwiseDistance default eps (added to the difference)


def _round_up(x, k):
    return (x + k - 1) // k * k


def _contrastive_loss_kernel(fscal_ref, iscal_ref, e1_ref, e2_ref, lbl_ref,
                             out_ref, *, masked):
    """One batch tile of the contrastive loss -> one (8, 128) partial-sum block.

    fscal_ref : SMEM (1,) f32   -> [margin m]
    iscal_ref : SMEM (1,) i32   -> [true batch size B] (for ragged-tail masking)
    e1_ref    : VMEM (TB, D)    embeddings (native dtype, upcast in-kernel)
    e2_ref    : VMEM (TB, D)
    lbl_ref   : VMEM (TB, 1) f32
    out_ref   : VMEM (8, 128) f32  partial sum at [0, 0], zeros elsewhere
    """
    i = pl.program_id(0)
    m = fscal_ref[0]

    # Fused: single f32 diff expression, sum-of-squares reduce, one sqrt per row.
    diff = e1_ref[...].astype(jnp.float32) - e2_ref[...].astype(jnp.float32) + _EPS
    dist = jnp.sqrt(jnp.sum(diff * diff, axis=-1, keepdims=True))      # (TB, 1)

    lbl = lbl_ref[...]
    L = (1.0 - lbl) * dist + lbl * jnp.maximum(m - dist, 0.0)           # (TB, 1)

    if masked:  # ragged tail tile: zero contribution of the garbage OOB rows
        tb = L.shape[0]
        row = i * tb + jax.lax.broadcasted_iota(jnp.int32, (tb, 1), 0)
        L = jnp.where(row < iscal_ref[0], L, 0.0)

    partial = jnp.sum(L)

    # Lane-dense, (8,128)-aligned output block; partial sum lives at [0, 0].
    r = jax.lax.broadcasted_iota(jnp.int32, (8, 128), 0)
    c = jax.lax.broadcasted_iota(jnp.int32, (8, 128), 1)
    out_ref[...] = jnp.where((r == 0) & (c == 0), partial, 0.0)


def contrastive_loss(embedd1, embedd2, label, m=5.0, *, batch_tile=None,
                     vmem_budget_bytes=32 * 1024 * 1024):
    """Pallas TPU implementation of ConstrastiveLoss.forward.

    embedd1, embedd2: (B, D) float32 / bfloat16 (read in native dtype)
    label:            (B,)   0 = similar pair, 1 = dissimilar pair
    returns:          scalar float32
    """
    B, D = embedd1.shape
    itemsize = jnp.dtype(embedd1.dtype).itemsize
    # Sublane packing multiple: f32 -> 8 rows, bf16 -> 16, int8/fp8 -> 32.
    sub = max(8, 32 // itemsize)

    if batch_tile is None:
        # 2 inputs x 2 pipeline buffers in native dtype, plus ~4 f32 row-wide
        # intermediates (upcasts / diff / squares) materialized in-kernel.
        per_row_bytes = 2 * 2 * D * itemsize + 4 * D * 4
        tb = vmem_budget_bytes // per_row_bytes
        tb = min(4096, tb // sub * sub)
    else:
        tb = _round_up(batch_tile, sub)
    tb = max(sub, min(tb, _round_up(B, sub)))

    n_tiles = pl.cdiv(B, tb)
    masked = (B % tb) != 0   # ragged tail block -> in-kernel row mask

    label2d = label.reshape(B, 1).astype(jnp.float32)

    # Scalar operands (SMEM via scalar prefetch): margin, true B.
    fscal = jnp.array([m], dtype=jnp.float32)
    iscal = jnp.array([B], dtype=jnp.int32)

    kernel = functools.partial(_contrastive_loss_kernel, masked=masked)

    partials = pl.pallas_call(
        kernel,
        out_shape=jax.ShapeDtypeStruct((n_tiles * 8, 128), jnp.float32),
        grid_spec=pltpu.PrefetchScalarGridSpec(
            num_scalar_prefetch=2,
            grid=(n_tiles,),
            in_specs=[
                pl.BlockSpec((tb, D), lambda i, fs, isc: (i, 0)),
                pl.BlockSpec((tb, D), lambda i, fs, isc: (i, 0)),
                pl.BlockSpec((tb, 1), lambda i, fs, isc: (i, 0)),
            ],
            out_specs=pl.BlockSpec((8, 128), lambda i, fs, isc: (i, 0)),
        ),
        compiler_params=pltpu.CompilerParams(
            # Distinct output block per grid step -> batch axis is parallel
            # (lets Mosaic shard tiles across both TCs on v7x).
            dimension_semantics=("parallel",),
            vmem_limit_bytes=48 * 1024 * 1024,
        ),
        cost_estimate=pl.CostEstimate(
            flops=5 * B * D,
            transcendentals=B,
            bytes_accessed=2 * B * D * itemsize + B * 4 + n_tiles * 8 * 128 * 4,
        ),
    )(fscal, iscal, embedd1, embedd2, label2d)

    # Tiny final reduction + exact divide-by-B (matches the torch reference).
    return jnp.sum(partials) / B


def _reference_loss(e1, e2, label, m=5.0):
    # Pure-JAX reference mirroring the PyTorch module exactly.
    diff = e1.astype(jnp.float32) - e2.astype(jnp.float32) + _EPS
    dist = jnp.sqrt(jnp.sum(diff * diff, axis=-1, keepdims=True))
    lbl = label.reshape(-1, 1).astype(jnp.float32)
    L = (1.0 - lbl) * dist + lbl * jnp.maximum(m - dist, 0.0)
    return jnp.sum(L) / L.shape[0]


if __name__ == "__main__":
    key = jax.random.PRNGKey(0)
    k1, k2, k3 = jax.random.split(key, 3)

    # Small shapes consistent with the module: batch of 8 embedding pairs, hidden=32.
    B, D = 8, 32
    embedd1 = jax.random.normal(k1, (B, D), dtype=jnp.float32)
    embedd2 = jax.random.normal(k2, (B, D), dtype=jnp.float32)
    label = jax.random.bernoulli(k3, 0.5, (B,)).astype(jnp.float32)

    loss = contrastive_loss(embedd1, embedd2, label, m=5.0)
    loss = jax.block_until_ready(loss)
    ref = _reference_loss(embedd1, embedd2, label, m=5.0)
    assert jnp.allclose(loss, ref, rtol=1e-5, atol=1e-5), (loss, ref)

    # Non-multiple-of-8 batch exercises the no-pad ragged/masked tail-tile path.
    B2 = 10
    e1b = jax.random.normal(k1, (B2, D), dtype=jnp.float32)
    e2b = jax.random.normal(k2, (B2, D), dtype=jnp.float32)
    lb = jax.random.bernoulli(k3, 0.5, (B2,)).astype(jnp.float32)
    loss2 = jax.block_until_ready(contrastive_loss(e1b, e2b, lb, m=5.0))
    ref2 = _reference_loss(e1b, e2b, lb, m=5.0)
    assert jnp.allclose(loss2, ref2, rtol=1e-5, atol=1e-5), (loss2, ref2)

    # Multi-tile path (forced small batch_tile) exercises the parallel
    # per-tile partial-sum grid.
    B3 = 24
    e1c = jax.random.normal(k1, (B3, D), dtype=jnp.float32)
    e2c = jax.random.normal(k2, (B3, D), dtype=jnp.float32)
    lc = jax.random.bernoulli(k3, 0.5, (B3,)).astype(jnp.float32)
    loss3 = jax.block_until_ready(contrastive_loss(e1c, e2c, lc, m=5.0, batch_tile=8))
    ref3 = _reference_loss(e1c, e2c, lc, m=5.0)
    assert jnp.allclose(loss3, ref3, rtol=1e-5, atol=1e-5), (loss3, ref3)

    print("KERNEL_OK")
</pallas_src>

<mosaic_0001>
module attributes {stable_mosaic.version = 11 : i64} {
  func.func @_contrastive_loss_kernel(%arg0: i32, %arg1: memref<1xf32, #tpu.memory_space<smem>>, %arg2: memref<1xi32, #tpu.memory_space<smem>>, %arg3: memref<8x32xf32, #tpu.memory_space<vmem>>, %arg4: memref<8x32xf32, #tpu.memory_space<vmem>>, %arg5: memref<8x1xf32, #tpu.memory_space<vmem>>, %arg6: memref<8x128xf32, #tpu.memory_space<vmem>>) attributes {dimension_semantics = [#tpu.dimension_semantics<parallel>], iteration_bounds = array<i64: 1>, scalar_prefetch = 2 : i64, scratch_operands = 0 : i64, tpu.core_type = #tpu.core_type<tc>, window_params = [{transform_indices = @transform_0, window_bounds = array<i64: 8, 32>}, {transform_indices = @transform_1, window_bounds = array<i64: 8, 32>}, {transform_indices = @transform_2, window_bounds = array<i64: 8, 1>}, {transform_indices = @transform_3, window_bounds = array<i64: 8, 128>}]} {
    %c0 = arith.constant 0 : index
    %0 = memref.load %arg1[%c0] : memref<1xf32, #tpu.memory_space<smem>>
    %c0_0 = arith.constant 0 : index
    %c0_1 = arith.constant 0 : index
    %1 = vector.load %arg3[%c0_0, %c0_1] : memref<8x32xf32, #tpu.memory_space<vmem>>, vector<8x32xf32>
    %c0_2 = arith.constant 0 : index
    %c0_3 = arith.constant 0 : index
    %2 = vector.load %arg4[%c0_2, %c0_3] : memref<8x32xf32, #tpu.memory_space<vmem>>, vector<8x32xf32>
    %3 = arith.subf %1, %2 : vector<8x32xf32>
    %cst = arith.constant 9.99999997E-7 : f32
    %4 = vector.broadcast %cst : f32 to vector<8x32xf32>
    %5 = arith.addf %3, %4 : vector<8x32xf32>
    %6 = arith.mulf %5, %5 : vector<8x32xf32>
    %cst_4 = arith.constant dense<0.000000e+00> : vector<8xf32>
    %7 = vector.multi_reduction <add>, %6, %cst_4 [1] : vector<8x32xf32> to vector<8xf32>
    %8 = vector.shape_cast %7 : vector<8xf32> to vector<8x1xf32>
    %9 = math.sqrt %8 : vector<8x1xf32>
    %c0_5 = arith.constant 0 : index
    %c0_6 = arith.constant 0 : index
    %10 = vector.load %arg5[%c0_5, %c0_6] : memref<8x1xf32, #tpu.memory_space<vmem>>, vector<8x1xf32>
    %cst_7 = arith.constant 1.000000e+00 : f32
    %11 = vector.broadcast %cst_7 : f32 to vector<8x1xf32>
    %12 = arith.subf %11, %10 : vector<8x1xf32>
    %13 = arith.mulf %12, %9 : vector<8x1xf32>
    %14 = vector.broadcast %0 : f32 to vector<8x1xf32>
    %15 = arith.subf %14, %9 : vector<8x1xf32>
    %cst_8 = arith.constant 0.000000e+00 : f32
    %16 = vector.broadcast %cst_8 : f32 to vector<8x1xf32>
    %17 = arith.maximumf %15, %16 : vector<8x1xf32>
    %18 = arith.mulf %10, %17 : vector<8x1xf32>
    %19 = arith.addf %13, %18 : vector<8x1xf32>
    %20 = vector.shape_cast %19 : vector<8x1xf32> to vector<1x8x1xf32>
    %cst_9 = arith.constant dense<0.000000e+00> : vector<1xf32>
    %21 = vector.multi_reduction <add>, %20, %cst_9 [1, 2] : vector<1x8x1xf32> to vector<1xf32>
    %22 = vector.shape_cast %21 : vector<1xf32> to vector<1x1x1xf32>
    %23 = vector.extract %22[0, 0, 0] : f32 from vector<1x1x1xf32>
    %24 = tpu.iota {dimensions = array<i32: 0>} : vector<8x128xi32>
    %25 = tpu.iota {dimensions = array<i32: 1>} : vector<8x128xi32>
    %c0_i32 = arith.constant 0 : i32
    %26 = vector.broadcast %c0_i32 : i32 to vector<8x128xi32>
    %27 = arith.cmpi eq, %24, %26 : vector<8x128xi32>
    %c0_i32_10 = arith.constant 0 : i32
    %28 = vector.broadcast %c0_i32_10 : i32 to vector<8x128xi32>
    %29 = arith.cmpi eq, %25, %28 : vector<8x128xi32>
    %30 = arith.andi %27, %29 : vector<8x128xi1>
    %cst_11 = arith.constant 0.000000e+00 : f32
    %31 = vector.broadcast %23 : f32 to vector<8x128xf32>
    %32 = vector.broadcast %cst_11 : f32 to vector<8x128xf32>
    %33 = arith.select %30, %31, %32 : vector<8x128xi1>, vector<8x128xf32>
    %c0_12 = arith.constant 0 : index
    %c0_13 = arith.constant 0 : index
    %34 = vector.load %arg6[%c0_12, %c0_13] : memref<8x128xf32, #tpu.memory_space<vmem>>, vector<8x128xf32>
    tpu.vector_store %arg6[%c0_12, %c0_13], %33 {strides = array<i32>} : memref<8x128xf32, #tpu.memory_space<vmem>>, vector<8x128xf32>,
    return
  }
  func.func @transform_0(%arg0: i32, %arg1: memref<1xf32, #tpu.memory_space<smem>>, %arg2: memref<1xi32, #tpu.memory_space<smem>>) -> (i32, i32) {
    %c0_i32 = arith.constant 0 : i32
    %c0_i32_0 = arith.constant 0 : i32
    return %arg0, %c0_i32 : i32, i32
  }
  func.func @transform_1(%arg0: i32, %arg1: memref<1xf32, #tpu.memory_space<smem>>, %arg2: memref<1xi32, #tpu.memory_space<smem>>) -> (i32, i32) {
    %c0_i32 = arith.constant 0 : i32
    %c0_i32_0 = arith.constant 0 : i32
    return %arg0, %c0_i32 : i32, i32
  }
  func.func @transform_2(%arg0: i32, %arg1: memref<1xf32, #tpu.memory_space<smem>>, %arg2: memref<1xi32, #tpu.memory_space<smem>>) -> (i32, i32) {
    %c0_i32 = arith.constant 0 : i32
    %c0_i32_0 = arith.constant 0 : i32
    return %arg0, %c0_i32 : i32, i32
  }
  func.func @transform_3(%arg0: i32, %arg1: memref<1xf32, #tpu.memory_space<smem>>, %arg2: memref<1xi32, #tpu.memory_space<smem>>) -> (i32, i32) {
    %c0_i32 = arith.constant 0 : i32
    %c0_i32_0 = arith.constant 0 : i32
    return %arg0, %c0_i32 : i32, i32
  }
}

</mosaic_0001>

<bundles_post_ra>
// kernel: tpu_custom_call.1
= control target key start
LH: loop header
LB: loop body
LE: loop exit
PB: predicated region body
PF: predicated region fallthrough
CT: control target
= control target key end

     0   :  { %s163_s0 = inlined_call_operand.<no memory space> [shape: f32[1], index: 0, kind: input, shape index: {}]   ;;  %s164_s1 = inlined_call_operand.<no memory space> [shape: s32[1], index: 1, kind: input, shape index: {}]   ;;  %s165_s2 = inlined_call_operand.vmem [shape: f32[8,32], index: 2, kind: input, shape index: {}]   ;;  %s166_s3 = inlined_call_operand.vmem [shape: f32[8,32], index: 3, kind: input, shape index: {}]   ;;  %s167_s4 = inlined_call_operand.vmem [shape: f32[8,1], index: 4, kind: input, shape index: {}]   ;;  %s168_s5 = inlined_call_operand.hbm [shape: f32[8,128], index: 5, kind: output, shape index: {}]  }
   0x1   :  { %v20_v0 = vld [vmem:[%s165_s2] sm:$0xff] }
   0x2   :  { %v21_v1 = vld [vmem:[%s166_s3] sm:$0xff] }
   0x3   :  { %12 = vsyncpa [#allocation6], 0  ;;  %v22_v2 = vsub.f32 %v20_v0, %v21_v1  ;;  %vm25_vm0 = vcmask 261120   ;;  %v36_v10 = vld [vmem:[%s167_s4] sm:$0xff]  ;;  %v39_v11 = vstv %s163_s0  ;;  %vm44_vm3 = vcmask 7168   ;;  %s108_s0 = smov [#allocation5]  }
   0x4   :  { %v37_v14 = vsub.f32 1.0, %v36_v10  ;;  %v55_v28 = vlaneseq  ;;  %s71_s3 = sshll.u32 %s108_s0, 4  ;;  %s72_s3 = int_to_ptr.vmem [resolvable:$true] %s71_s3 }
   0x5   :  { %v23_v3 = vadd.f32 1e-06, %v22_v2  ;;  %s84_s24 = scalar_lea.vmem %s72_s3, 128  ;;  %p89_p1 = scmp.lt.s32.totalorder %s72_s3, %s72_s3 }
   0x6   :  { %v56_v29 = vshrl.u32 %v55_v28, 7  ;;  %v58_v30 = vand.u32 127, %v55_v28  ;;  %p85_p0 = scmp.ne.s32.totalorder %s72_s3, %s84_s24  ;;  %p90_p2 = scmp.lt.s32.totalorder %s84_s24, %s84_s24 }
   0x7   :  { %v24_v4 = vmul.f32 %v23_v3, %v23_v3 }
   0x8   :  { %vm59_vm4 = vcmp.eq.s32.totalorder %v56_v29, 0  ;;  %vm60_vm5 = vcmp.eq.s32.totalorder %v58_v30, 0  ;;  %p91_p3 = por %p90_p2, %p89_p1 }
   0x9   :  { %v26_v5 = vsel %vm25_vm0, %v24_v4, 0.0  ;;  %vm61_vm6 = vmand %vm59_vm4, %vm60_vm5 }
   0xa   :  { %27 = vadd.xlane.f32.xlu0 %v26_v5  ;;  %p92_p4 = pnand %p91_p3, %p85_p0 }
  0x97   :  { %v28_v6 = vpop.xlane.xlu0 %27 }
  0x98   :  { %82 = vrsqrt.f32 %v28_v6  ;;  %vm31_vm1 = vcmp.eq.f32.partialorder %v28_v6, inf  ;;  %v34_v9 = vand.u32 2147483648, %v28_v6  ;;  %vm33_vm2 = vcmp.eq.f32.partialorder %v28_v6, 0.0 }
  0xa2   :  { %v83_v7 = vpop.eup %82 }
  0xa3   :  { %v30_v8 = vmul.f32 %v83_v7, %v28_v6 }
  0xa5   :  { %v32_v12 = vsel %vm31_vm1, %v28_v6, %v30_v8 }
  0xa6   :  { %v35_v13 = vsel %vm33_vm2, %v34_v9, %v32_v12 }
  0xa7   :  { %v40_v15 = vsub.f32 %v39_v11, %v35_v13  ;;  %v38_v17 = vmul.f32 %v37_v14, %v35_v13 }
  0xa9   :  { %v41_v16 = vmax.f32 %v40_v15, 0.0 }
  0xab   :  { %v42_v18 = vmul.f32 %v41_v16, %v36_v10 }
  0xad   :  { %v43_v19 = vadd.f32 %v42_v18, %v38_v17 }
  0xaf   :  { %v45_v20 = vsel %vm44_vm3, %v43_v19, 0.0 }
  0xb0   :  { %46 = vadd.xlane.f32.xlu0 %v45_v20 }
 0x13d   :  { %v47_v21 = vpop.xlane.xlu0 %46 }
 0x13e   :  { %v48_v22 = vrot.slane %v47_v21, 4 }
 0x140   :  { %v49_v23 = vadd.f32 %v48_v22, %v47_v21 }
 0x142   :  { %v50_v24 = vrot.slane %v49_v23, 2 }
 0x144   :  { %v51_v25 = vadd.f32 %v50_v24, %v49_v23 }
 0x146   :  { %v52_v26 = vrot.slane %v51_v25, 1 }
 0x148   :  { %v53_v27 = vadd.f32 %v52_v26, %v51_v25 }
 0x14a   :  { %79 = vpush %v53_v27 }
 0x17b   :  { %s80_s4 = spop %79 }
 0x17c   :  { %v62_v31 = vstv %s80_s4 }
 0x17d   :  { %v63_v32 = vsel %vm61_vm6, %v62_v31, 0.0 }
 0x17e   :  { %64 = vst [vmem:[#allocation5] sm:$0xff] %v63_v32 }
 0x17f   :  { %95 = shalt.err (!%p92_p4)
}
 0x180   :  { %s96_s27 = scalar_lea.hbm %s168_s5, 128 }
 0x181   :  { %p97_p5 = scmp.ne.s32.totalorder %s168_s5, %s96_s27  ;;  %p100_p6 = scmp.lt.u32.totalorder %s96_s27, %s168_s5 }
 0x183   :  { %p102_p7 = pnand %p100_p6, %p97_p5 }
 0x185   :  { %105 = shalt.err (!%p102_p7)
}
 0x186   :  { %74 = dma.vmem_to_hbm [thread:$0]  %s72_s3, 128, %s168_s5, [#allocation6]  }
 0x187   :  { %106 = dma.done.wait [#allocation6], 128  }
 0x188   :  { %107 = vsyncadd [#allocation6], 4294967168 }
 0x189   :  { %78 = vsyncpa [#allocation6], 1 }

</bundles_post_ra>
